<compile_context>
chip_gen: v7x
topology: tpu7x:2x2x1
jax: 0.10.0
libtpu: 0.0.40
codegen_flags: <defaults>
</compile_context>

<pallas_src>
import math
from functools import partial

import numpy as np

import jax
import jax.numpy as jnp
from jax import lax
from jax.experimental import pallas as pl
from jax.experimental.pallas import tpu as pltpu


LANES = 128
OBS_DIM = 16
OBS_PER_ROW = LANES // OBS_DIM            # 8 interleaved observations per row
_LOG2PI = float(math.log(2.0 * math.pi))


def _round_up(x: int, m: int) -> int:
    return ((x + m - 1) // m) * m


def _default_num_cores() -> int:
    """1 TensorCore on v5e/v6e, 2 on v7x.  Probe defensively; default to 1."""
    try:
        info = pltpu.get_tpu_info()
        for name in ("num_tensorcores", "tensorcore_count", "num_cores",
                     "core_count", "cores_per_chip"):
            v = getattr(info, name, None)
            if isinstance(v, int) and v >= 1:
                return max(1, min(int(v), 2))
    except Exception:
        pass
    return 1


def _make_quad_kernel(tile_rows: int, tiles_per_core: int, valid_rows: int,
                      needs_mask: bool):
    """Accumulates per-lane quadratic-form contributions for one core.

    coef_ref: (4, 8, 128) full-vreg coefficient planes
        [0] mu_posterior tiled over lanes (interleaved x,y)
        [1] the same, shifted left by one lane (for the cross term)
        [2] diag coeffs  (sp00 on even lanes, sp11 on odd lanes)
        [3] cross coeffs (2*sp01 on even lanes, 0 on odd lanes)
    obs_ref : (tile_rows, 128) lane-dense tile (8 interleaved obs per row)
    out_ref : (8, 128) per-core partial sums, resident across the inner axis.
    """
    groups = tile_rows // 8

    def kernel(coef_ref, obs_ref, out_ref):
        t = pl.program_id(1)

        @pl.when(t == 0)
        def _init():
            out_ref[...] = jnp.zeros_like(out_ref)

        mp = coef_ref[0]          # (8, 128)
        mpn = coef_ref[1]         # (8, 128)
        aa = coef_ref[2]          # (8, 128)
        bb = coef_ref[3]          # (8, 128)

        x = obs_ref[...]                                   # (tile_rows, 128)
        # Neighbour lane via the XLU (off the VPU critical path):
        #   xn[:, j] = x[:, (j + 1) % 128].
        # The roll-by-one cross-term trick is only correct because bb is zero
        # on every odd lane (incl. lane 127, so the wrap-around is benign);
        # keep OBS_DIM / the x,y interleave / LANES in sync with this.
        xn = pltpu.roll(x, LANES - 1, 1)

        d = x.reshape(groups, 8, LANES) - mp               # full-vreg operands
        dn = xn.reshape(groups, 8, LANES) - mpn
        # sp00*dx^2 + sp11*dy^2 (every lane) + 2*sp01*dx*dy (even lanes only).
        q = (aa * d + bb * dn) * d                          # (groups, 8, 128)

        if not needs_mask:
            out_ref[...] += jnp.sum(q, axis=0)
        else:
            c = pl.program_id(0)
            row0 = (c * tiles_per_core + t) * tile_rows

            @pl.when(row0 + tile_rows <= valid_rows)        # fully valid tile
            def _full():
                out_ref[...] += jnp.sum(q, axis=0)

            @pl.when(jnp.logical_and(row0 < valid_rows,
                                     row0 + tile_rows > valid_rows))
            def _partial():
                # Rows beyond valid_rows hold stale VMEM garbage (the DMA only
                # fills the valid prefix of the boundary block): zero them.
                g = lax.broadcasted_iota(jnp.int32, q.shape, 0)
                s = lax.broadcasted_iota(jnp.int32, q.shape, 1)
                absr = row0 + g * 8 + s
                qm = jnp.where(absr < valid_rows, q, 0.0)
                out_ref[...] += jnp.sum(qm, axis=0)
            # Tiles with row0 >= valid_rows (index-map-clamped duplicates of
            # the last real block) contribute nothing.

    return kernel


def _block_precisions(params):
    """Closed-form inverse of the 8 independent 2x2 blocks S = B B^T + 1e-6 I."""
    p = params.reshape(8, 4).astype(jnp.float32)
    a, b, c, d = p[:, 0], p[:, 1], p[:, 2], p[:, 3]
    s00 = a * a + b * b + 1e-6
    s01 = a * c + b * d
    s11 = c * c + d * d + 1e-6
    inv_det = 1.0 / (s00 * s11 - s01 * s01)
    return s11 * inv_det, -s01 * inv_det, s00 * inv_det


@partial(jax.jit, static_argnames=("tile_rows", "num_cores"))
def _bayes_fitting_loss_impl(obs, mu_likelihood, mu_prior_pose,
                             sigma_prior_params, sigma_likelihood_params,
                             tile_rows: int, num_cores: int):
    obs = obs.astype(jnp.float32)
    n_obs, obs_dim = obs.shape
    assert obs_dim == OBS_DIM

    mu_likelihood = mu_likelihood.astype(jnp.float32)
    mu_prior_pose = mu_prior_pose.astype(jnp.float32)

    # ---------- grid-invariant algebra (hoisted out of the kernel) ----------
    pp00, pp01, pp11 = _block_precisions(sigma_prior_params)       # prior precision
    lp00, lp01, lp11 = _block_precisions(sigma_likelihood_params)  # likelihood precision

    q00 = pp00 + lp00
    q01 = pp01 + lp01
    q11 = pp11 + lp11
    detq = q00 * q11 - q01 * q01
    logdet = jnp.sum(jnp.log(detq))          # logdet of posterior precision
    sp00 = q11 / detq                        # posterior covariance blocks
    sp01 = -q01 / detq
    sp11 = q00 / detq

    # transform_mu_gpu (version=2): rotate mu_likelihood about centroid + translate.
    mlx = mu_likelihood[0::2]
    mly = mu_likelihood[1::2]
    cx = jnp.mean(mlx)
    cy = jnp.mean(mly)
    ct = jnp.cos(mu_prior_pose[2])
    st = jnp.sin(mu_prior_pose[2])
    rx = mlx - cx
    ry = mly - cy
    mpr_x = ct * rx - st * ry + mu_prior_pose[0]
    mpr_y = st * rx + ct * ry + mu_prior_pose[1]

    # mu_posterior_pred = Sigma_post @ (P_prior @ mu_prior + P_like @ mu_like)
    rhs_x = pp00 * mpr_x + pp01 * mpr_y + lp00 * mlx + lp01 * mly
    rhs_y = pp01 * mpr_x + pp11 * mpr_y + lp01 * mlx + lp11 * mly
    mp_x = sp00 * rhs_x + sp01 * rhs_y
    mp_y = sp01 * rhs_x + sp11 * rhs_y

    # Interleaved 16-vectors, tiled across the 128-lane axis (8 obs per row),
    # then pre-broadcast to full (8, 128) vreg planes.
    mp16 = jnp.stack([mp_x, mp_y], axis=1).reshape(OBS_DIM)
    a16 = jnp.stack([sp00, sp11], axis=1).reshape(OBS_DIM)
    # b16 MUST be zero on every odd position: the in-kernel lane roll wraps at
    # lane 127 and relies on that zero to make the wrap-around harmless.
    b16 = jnp.stack([2.0 * sp01, jnp.zeros_like(sp01)], axis=1).reshape(OBS_DIM)
    mp128 = jnp.tile(mp16, OBS_PER_ROW)
    mpn128 = jnp.roll(mp128, -1)             # mpn[j] = mp[(j + 1) % 128]
    aa128 = jnp.tile(a16, OBS_PER_ROW)
    bb128 = jnp.tile(b16, OBS_PER_ROW)
    coef = jnp.broadcast_to(
        jnp.stack([mp128, mpn128, aa128, bb128])[:, None, :], (4, 8, LANES))

    # ------------------- lane-dense obs layout & tail -----------------------
    n_full = (n_obs // OBS_PER_ROW) * OBS_PER_ROW
    rows = n_full // OBS_PER_ROW

    if n_full < n_obs:
        # <=7 leftover observations: plain JAX (avoids any full-array pad copy).
        tail = obs[n_full:]
        tdx = tail[:, 0::2] - mp_x
        tdy = tail[:, 1::2] - mp_y
        tail_quad = jnp.sum(sp00 * tdx * tdx + sp11 * tdy * tdy
                            + 2.0 * sp01 * tdx * tdy)
    else:
        tail_quad = jnp.float32(0.0)

    if rows == 0:
        quad_sum = tail_quad
    else:
        obs_r = obs[:n_full].reshape(rows, LANES)     # (N//8, 128) lane-dense

        # --------------------------- tiling / grid ---------------------------
        tr_cap = max(8, min(int(tile_rows), 16384))   # <= 8 MiB per buffer
        rows_per_core = pl.cdiv(rows, num_cores)
        tr = min(tr_cap, _round_up(rows_per_core, 8))
        tr = max(8, (tr // 8) * 8)
        tiles_per_core = pl.cdiv(rows_per_core, tr)
        total_tiles = num_cores * tiles_per_core
        real_blocks = pl.cdiv(rows, tr)
        needs_mask = (total_tiles * tr != rows)
        needs_clamp = total_tiles > real_blocks
        last_block = real_blocks - 1

        if needs_clamp:
            obs_map = lambda c, t: (jnp.minimum(c * tiles_per_core + t,
                                                last_block), 0)
        else:
            obs_map = lambda c, t: (c * tiles_per_core + t, 0)

        kernel = _make_quad_kernel(tr, tiles_per_core, rows, needs_mask)

        partials = pl.pallas_call(
            kernel,
            out_shape=jax.ShapeDtypeStruct((num_cores * 8, LANES), jnp.float32),
            grid_spec=pltpu.PrefetchScalarGridSpec(
                num_scalar_prefetch=0,
                grid=(num_cores, tiles_per_core),
                in_specs=[
                    pl.BlockSpec((4, 8, LANES), lambda c, t: (0, 0, 0)),  # coeffs
                    pl.BlockSpec((tr, LANES), obs_map),                   # obs tiles
                ],
                out_specs=pl.BlockSpec((8, LANES), lambda c, t: (c, 0)),
            ),
            compiler_params=pltpu.CompilerParams(
                # "parallel" on the core axis; on v7x CORE_PARALLEL / core_map
                # would guarantee the 2-TC split, but "parallel" is safe on
                # single-core chips too.
                dimension_semantics=("parallel", "arbitrary"),
                vmem_limit_bytes=32 * 1024 * 1024),
        )(coef, obs_r)
        quad_sum = jnp.sum(partials) + tail_quad

    n = jnp.float32(n_obs)
    # The module hard-codes self.dim = 32 for diag_only=False even though the
    # observation dimension is 16 -- replicated intentionally.
    dim = 32.0
    # loss = -sum_n [ -0.5*dim*log(2pi) - 0.5*logdet - 0.5*quad_n ]
    return n * (0.5 * dim * _LOG2PI + 0.5 * logdet) + 0.5 * quad_sum


def bayes_fitting_loss(obs, mu_likelihood, mu_prior_pose,
                       sigma_prior_params, sigma_likelihood_params,
                       tile_rows: int = 8192, num_cores=None):
    if num_cores is None:
        num_cores = _default_num_cores()
    return _bayes_fitting_loss_impl(obs, mu_likelihood, mu_prior_pose,
                                    sigma_prior_params, sigma_likelihood_params,
                                    tile_rows=int(tile_rows),
                                    num_cores=int(num_cores))


def reference_loss(obs, mu_likelihood, mu_prior_pose, prior_params, like_params):
    """Pure-JAX replica of the PyTorch forward (dense 16x16 linear algebra)."""
    def build_block_diag(params):
        M = jnp.zeros((16, 16), dtype=jnp.float32)
        for i in range(8):
            j, k = 2 * i, 4 * i
            blk = params[k:k + 4].reshape(2, 2)
            blk = blk @ blk.T + jnp.eye(2, dtype=jnp.float32) * 1e-6
            M = M.at[j:j + 2, j:j + 2].set(blk)
        return M

    Sp = build_block_diag(prior_params)
    Sl = build_block_diag(like_params)
    Pp = jnp.linalg.inv(Sp)
    Pl = jnp.linalg.inv(Sl)
    Q = Pp + Pl
    Sq = jnp.linalg.inv(Q)

    x = mu_likelihood[0::2]
    y = mu_likelihood[1::2]
    pts = jnp.stack([x, y])
    cen = pts.mean(axis=1, keepdims=True)
    th = mu_prior_pose[2]
    ct, st = jnp.cos(th), jnp.sin(th)
    R = jnp.stack([jnp.stack([ct, -st]), jnp.stack([st, ct])])
    pts = R @ (pts - cen) + mu_prior_pose[:2, None]
    mu_prior = jnp.zeros(16, dtype=jnp.float32).at[0::2].set(pts[0]).at[1::2].set(pts[1])

    mu_post = Sq @ (Pp @ mu_prior + Pl @ mu_likelihood)
    diff = obs - mu_post
    _, logdetQ = jnp.linalg.slogdet(Q)
    quad = jnp.sum((diff @ Sq) * diff, axis=1)
    log_terms = (-0.5 * 32.0 * jnp.log(jnp.float32(2.0 * math.pi))
                 - 0.5 * logdetQ - 0.5 * quad)
    return -jnp.sum(log_terms)


if __name__ == "__main__":
    key = jax.random.PRNGKey(0)
    k = jax.random.split(key, 8)
    cov_min, cov_max = 0.01, 10.0

    # Deterministic parameter init mirroring BayesFittingNet.__init__.
    mu_prior_pose = jnp.array([
        jax.random.uniform(k[0], (), minval=15.0, maxval=25.0),
        jax.random.uniform(k[1], (), minval=15.0, maxval=25.0),
        jax.random.uniform(k[2], (), minval=-math.pi / 16.0, maxval=math.pi / 16.0),
    ], dtype=jnp.float32)

    def init_sigma_params(subkey):
        p = jax.random.uniform(subkey, (32,), minval=cov_min, maxval=cov_max,
                               dtype=jnp.float32)
        p = p.reshape(8, 4)
        m = jnp.minimum(p[:, 0], p[:, 3]) / 2.0
        p = p.at[:, 1].set(m).at[:, 2].set(m)
        return p.reshape(32)

    sigma_prior_params = init_sigma_params(k[3])
    sigma_likelihood_params = init_sigma_params(k[4])

    # mu_likelihood: 8 (x, y) landmark points, interleaved -> (16,)
    angles = jnp.linspace(0.0, 2.0 * math.pi, 8, endpoint=False)
    mu_xy = jnp.stack([20.0 + 5.0 * jnp.cos(angles),
                       20.0 + 5.0 * jnp.sin(angles)], axis=1)   # (8, 2)
    mu_likelihood = mu_xy.reshape(16).astype(jnp.float32)

    # --- variant 1: default path (single grid step at this small N) ---------
    N = 512
    obs = (mu_likelihood[None, :]
           + 0.5 * jax.random.normal(k[5], (N, 16), dtype=jnp.float32))
    loss = bayes_fitting_loss(obs, mu_likelihood, mu_prior_pose,
                              sigma_prior_params, sigma_likelihood_params)
    loss = jax.block_until_ready(loss)
    ref = reference_loss(obs, mu_likelihood, mu_prior_pose,
                         sigma_prior_params, sigma_likelihood_params)
    np.testing.assert_allclose(np.asarray(loss), np.asarray(ref), rtol=5e-3)

    # --- variant 2: exercises multi-step accumulation, the pl.when-gated
    #     boundary mask, a clamped fully-OOB tile, and the <8-obs JAX tail ----
    N2 = 268
    obs2 = (mu_likelihood[None, :]
            + 0.5 * jax.random.normal(k[6], (N2, 16), dtype=jnp.float32))
    loss2 = bayes_fitting_loss(obs2, mu_likelihood, mu_prior_pose,
                               sigma_prior_params, sigma_likelihood_params,
                               tile_rows=8, num_cores=2)
    loss2 = jax.block_until_ready(loss2)
    ref2 = reference_loss(obs2, mu_likelihood, mu_prior_pose,
                          sigma_prior_params, sigma_likelihood_params)
    np.testing.assert_allclose(np.asarray(loss2), np.asarray(ref2), rtol=5e-3)

    print("KERNEL_OK")
</pallas_src>

<mosaic_0001>
module attributes {stable_mosaic.version = 11 : i64} {
  func.func @kernel(%arg0: i32, %arg1: i32, %arg2: memref<4x8x128xf32, #tpu.memory_space<vmem>>, %arg3: memref<64x128xf32, #tpu.memory_space<vmem>>, %arg4: memref<8x128xf32, #tpu.memory_space<vmem>>) attributes {dimension_semantics = [#tpu.dimension_semantics<parallel>, #tpu.dimension_semantics<arbitrary>], iteration_bounds = array<i64: 1, 1>, scalar_prefetch = 0 : i64, scratch_operands = 0 : i64, tpu.core_type = #tpu.core_type<tc>, window_params = [{pipeline_mode = #tpu.pipeline_mode<synchronous>, transform_indices = @transform_0, window_bounds = array<i64: 4, 8, 128>}, {transform_indices = @transform_1, window_bounds = array<i64: 64, 128>}, {transform_indices = @transform_2, window_bounds = array<i64: 8, 128>}]} {
    %c0_i32 = arith.constant 0 : i32
    %0 = arith.cmpi eq, %arg1, %c0_i32 : i32
    %1 = arith.extui %0 : i1 to i32
    %c0_i32_0 = arith.constant 0 : i32
    %2 = arith.cmpi ne, %1, %c0_i32_0 : i32
    scf.if %2 {
      %cst_15 = arith.constant 0.000000e+00 : f32
      %33 = vector.broadcast %cst_15 : f32 to vector<8x128xf32>
      %c0_16 = arith.constant 0 : index
      %c0_17 = arith.constant 0 : index
      %34 = vector.load %arg4[%c0_16, %c0_17] : memref<8x128xf32, #tpu.memory_space<vmem>>, vector<8x128xf32>
      tpu.vector_store %arg4[%c0_16, %c0_17], %33 {strides = array<i32>} : memref<8x128xf32, #tpu.memory_space<vmem>>, vector<8x128xf32>,
    } else {
    }
    %c0 = arith.constant 0 : index
    %c0_1 = arith.constant 0 : index
    %c0_2 = arith.constant 0 : index
    %3 = vector.load %arg2[%c0, %c0_1, %c0_2] : memref<4x8x128xf32, #tpu.memory_space<vmem>>, vector<1x8x128xf32>
    %4 = vector.shape_cast %3 : vector<1x8x128xf32> to vector<8x128xf32>
    %c1 = arith.constant 1 : index
    %c0_3 = arith.constant 0 : index
    %c0_4 = arith.constant 0 : index
    %5 = vector.load %arg2[%c1, %c0_3, %c0_4] : memref<4x8x128xf32, #tpu.memory_space<vmem>>, vector<1x8x128xf32>
    %6 = vector.shape_cast %5 : vector<1x8x128xf32> to vector<8x128xf32>
    %c2 = arith.constant 2 : index
    %c0_5 = arith.constant 0 : index
    %c0_6 = arith.constant 0 : index
    %7 = vector.load %arg2[%c2, %c0_5, %c0_6] : memref<4x8x128xf32, #tpu.memory_space<vmem>>, vector<1x8x128xf32>
    %8 = vector.shape_cast %7 : vector<1x8x128xf32> to vector<8x128xf32>
    %c3 = arith.constant 3 : index
    %c0_7 = arith.constant 0 : index
    %c0_8 = arith.constant 0 : index
    %9 = vector.load %arg2[%c3, %c0_7, %c0_8] : memref<4x8x128xf32, #tpu.memory_space<vmem>>, vector<1x8x128xf32>
    %10 = vector.shape_cast %9 : vector<1x8x128xf32> to vector<8x128xf32>
    %c0_9 = arith.constant 0 : index
    %c0_10 = arith.constant 0 : index
    %11 = vector.load %arg3[%c0_9, %c0_10] : memref<64x128xf32, #tpu.memory_space<vmem>>, vector<64x128xf32>
    %c127_i32 = arith.constant 127 : i32
    %12 = tpu.dynamic_rotate %11 by %c127_i32 dim 1 : vector<64x128xf32>, i32 -> vector<64x128xf32>
    %13 = vector.shape_cast %11 : vector<64x128xf32> to vector<8x8x128xf32>
    %14 = vector.shape_cast %4 : vector<8x128xf32> to vector<1x8x128xf32>
    %15 = vector.broadcast %14 : vector<1x8x128xf32> to vector<8x8x128xf32>
    %16 = arith.subf %13, %15 : vector<8x8x128xf32>
    %17 = vector.shape_cast %12 : vector<64x128xf32> to vector<8x8x128xf32>
    %18 = vector.shape_cast %6 : vector<8x128xf32> to vector<1x8x128xf32>
    %19 = vector.broadcast %18 : vector<1x8x128xf32> to vector<8x8x128xf32>
    %20 = arith.subf %17, %19 : vector<8x8x128xf32>
    %21 = vector.shape_cast %8 : vector<8x128xf32> to vector<1x8x128xf32>
    %22 = vector.broadcast %21 : vector<1x8x128xf32> to vector<8x8x128xf32>
    %23 = arith.mulf %22, %16 : vector<8x8x128xf32>
    %24 = vector.shape_cast %10 : vector<8x128xf32> to vector<1x8x128xf32>
    %25 = vector.broadcast %24 : vector<1x8x128xf32> to vector<8x8x128xf32>
    %26 = arith.mulf %25, %20 : vector<8x8x128xf32>
    %27 = arith.addf %23, %26 : vector<8x8x128xf32>
    %28 = arith.mulf %27, %16 : vector<8x8x128xf32>
    %c0_11 = arith.constant 0 : index
    %c0_12 = arith.constant 0 : index
    %29 = vector.load %arg4[%c0_11, %c0_12] : memref<8x128xf32, #tpu.memory_space<vmem>>, vector<8x128xf32>
    %cst = arith.constant dense<0.000000e+00> : vector<8x128xf32>
    %30 = vector.multi_reduction <add>, %28, %cst [0] : vector<8x8x128xf32> to vector<8x128xf32>
    %31 = arith.addf %29, %30 : vector<8x128xf32>
    %c0_13 = arith.constant 0 : index
    %c0_14 = arith.constant 0 : index
    %32 = vector.load %arg4[%c0_13, %c0_14] : memref<8x128xf32, #tpu.memory_space<vmem>>, vector<8x128xf32>
    tpu.vector_store %arg4[%c0_13, %c0_14], %31 {strides = array<i32>} : memref<8x128xf32, #tpu.memory_space<vmem>>, vector<8x128xf32>,
    return
  }
  func.func @transform_0(%arg0: i32, %arg1: i32) -> (i32, i32, i32) {
    %c0_i32 = arith.constant 0 : i32
    %c0_i32_0 = arith.constant 0 : i32
    %c0_i32_1 = arith.constant 0 : i32
    %c0_i32_2 = arith.constant 0 : i32
    return %c0_i32, %c0_i32_0, %c0_i32_1 : i32, i32, i32
  }
  func.func @transform_1(%arg0: i32, %arg1: i32) -> (i32, i32) {
    %c1_i32 = arith.constant 1 : i32
    %0 = arith.muli %arg0, %c1_i32 : i32
    %1 = arith.addi %0, %arg1 : i32
    %c0_i32 = arith.constant 0 : i32
    %c0_i32_0 = arith.constant 0 : i32
    return %1, %c0_i32 : i32, i32
  }
  func.func @transform_2(%arg0: i32, %arg1: i32) -> (i32, i32) {
    %c0_i32 = arith.constant 0 : i32
    %c0_i32_0 = arith.constant 0 : i32
    return %arg0, %c0_i32 : i32, i32
  }
}

</mosaic_0001>

<bundles_post_ra>
// kernel: tile.14
= control target key start
LH: loop header
LB: loop body
LE: loop exit
PB: predicated region body
PF: predicated region fallthrough
CT: control target
= control target key end

     0   :  { %s67_s10 = smov 14   ;;  %s68_s11 = smov 10   ;;  %vm3_vm0 = vcmask 15360   ;;  %vm9_vm1 = vcmask 130160   ;;  %vm15_vm2 = vcmask 113760   ;;  %vm21_vm3 = vcmask 97360   ;;  %s111_s0 = inlined_call_operand.vmem [shape: f32[8,2], index: 0, kind: input, shape index: {}]   ;;  %s112_s1 = inlined_call_operand.vmem [shape: f32[16], index: 1, kind: output, shape index: {}]  }
   0x1   :  { %v53_v0 = vld [vmem:[%s111_s0 + $0x7] sm:$0x1]   ;;  %v55_v1 = vld [vmem:[%s111_s0 + $0x5] sm:$0x1]   ;;  %v54_v2 = vld [vmem:[%s111_s0 + $0x6] sm:$0x1]  }
   0x2   :  { %7 = vrot.lane.b32.xlu0 %v53_v0, %s67_s10  ;;  %19 = vrot.lane.b32.xlu1 %v55_v1, %s68_s11  ;;  %v56_v3 = vld [vmem:[%s111_s0 + $0x4] sm:$0x1]   ;;  %v2_v4 = vld [vmem:[%s111_s0] sm:$0x1]   ;;  %s69_s18 = smov 12   ;;  %s70_s19 = smov 8  }
   0x3   :  { %4 = vst.msk [vmem:[#allocation0] sm:$0x1] %vm3_vm0, %v2_v4   ;;  %v57_v5 = vld [vmem:[%s111_s0 + $0x3] sm:$0x1]   ;;  %v58_v6 = vld [vmem:[%s111_s0 + $0x2] sm:$0x1]  }
   0x4   :  { %s71_s24 = smov 6   ;;  %s72_s25 = smov 4   ;;  %v59_v7 = vld [vmem:[%s111_s0 + $0x1] sm:$0x1]   ;;  %vm27_vm4 = vcmask 80960   ;;  %vm33_vm5 = vcmask 64560  }
   0x5   :  { %s73_s0 = smov 2   ;;  %vm39_vm6 = vcmask 48160   ;;  %vm45_vm7 = vcmask 31760  }
   0x6   :  { %13 = vrot.lane.b32.xlu0 %v54_v2, %s69_s18  ;;  %25 = vrot.lane.b32.xlu1 %v56_v3, %s70_s19 }
   0xa   :  { %31 = vrot.lane.b32.xlu0 %v57_v5, %s71_s24  ;;  %37 = vrot.lane.b32.xlu1 %v58_v6, %s72_s25 }
   0xe   :  { %43 = vrot.lane.b32.xlu0 %v59_v7, %s73_s0 }
  0x74   :  { %v8_v8 = vpop.permute.xlu0 %7   ;;  %v20_v9 = vpop.permute.xlu1 %19  }
  0x75   :  { %10 = vst.msk [vmem:[#allocation0] sm:$0x1] %vm9_vm1, %v8_v8  }
  0x78   :  { %v14_v10 = vpop.permute.xlu0 %13   ;;  %v26_v11 = vpop.permute.xlu1 %25  }
  0x79   :  { %16 = vst.msk [vmem:[#allocation0] sm:$0x1] %vm15_vm2, %v14_v10  }
  0x7a   :  { %22 = vst.msk [vmem:[#allocation0] sm:$0x1] %vm21_vm3, %v20_v9  }
  0x7b   :  { %28 = vst.msk [vmem:[#allocation0] sm:$0x1] %vm27_vm4, %v26_v11  }
  0x7c   :  { %v32_v12 = vpop.permute.xlu0 %31   ;;  %v38_v13 = vpop.permute.xlu1 %37  }
  0x7d   :  { %34 = vst.msk [vmem:[#allocation0] sm:$0x1] %vm33_vm5, %v32_v12  }
  0x7e   :  { %40 = vst.msk [vmem:[#allocation0] sm:$0x1] %vm39_vm6, %v38_v13  }
  0x80   :  { %v44_v14 = vpop.permute.xlu0 %43  }
  0x81   :  { %46 = vst.msk [vmem:[#allocation0] sm:$0x1] %vm45_vm7, %v44_v14  }
  0x88   :  { %v50_v15 = vld [vmem:[#allocation0] sm:$0x1] }
  0x89   :  { %52 = vst [vmem:[%s112_s1] sm:$0x1] %v50_v15 }

// kernel: tile.15
= control target key start
LH: loop header
LB: loop body
LE: loop exit
PB: predicated region body
PF: predicated region fallthrough
CT: control target
= control target key end

     0   :  { %s22_s0 = inlined_call_operand.vmem [shape: f32[16], index: 0, kind: input, shape index: {}]   ;;  %s23_s1 = inlined_call_operand.vmem [shape: f32[8,16], index: 1, kind: output, shape index: {}]  }
   0x1   :  { %v4_v0 = vld [vmem:[%s22_s0] ss:$0 sm:$0xff] }
   0x2   :  { %5 = vst [vmem:[%s23_s1] sm:$0xff] %v4_v0 }

// kernel: tile.16
= control target key start
LH: loop header
LB: loop body
LE: loop exit
PB: predicated region body
PF: predicated region fallthrough
CT: control target
= control target key end

     0   :  { %s67_s10 = smov 112   ;;  %s68_s11 = smov 80   ;;  %vm3_vm0 = vcmask 130048   ;;  %vm9_vm1 = vcmask 1048448   ;;  %vm15_vm2 = vcmask 917248   ;;  %vm21_vm3 = vcmask 786048   ;;  %s111_s0 = inlined_call_operand.vmem [shape: f32[8,16], index: 0, kind: input, shape index: {}]   ;;  %s112_s1 = inlined_call_operand.vmem [shape: f32[128], index: 1, kind: output, shape index: {}]  }
   0x1   :  { %v53_v0 = vld [vmem:[%s111_s0 + $0x7] sm:$0x1]   ;;  %v55_v1 = vld [vmem:[%s111_s0 + $0x5] sm:$0x1]   ;;  %v54_v2 = vld [vmem:[%s111_s0 + $0x6] sm:$0x1]  }
   0x2   :  { %7 = vrot.lane.b32.xlu0 %v53_v0, %s67_s10  ;;  %19 = vrot.lane.b32.xlu1 %v55_v1, %s68_s11  ;;  %v56_v3 = vld [vmem:[%s111_s0 + $0x4] sm:$0x1]   ;;  %v2_v4 = vld [vmem:[%s111_s0] sm:$0x1]   ;;  %s69_s18 = smov 96   ;;  %s70_s19 = smov 64  }
   0x3   :  { %4 = vst.msk [vmem:[#allocation0] sm:$0x1] %vm3_vm0, %v2_v4   ;;  %v57_v5 = vld [vmem:[%s111_s0 + $0x3] sm:$0x1]   ;;  %v58_v6 = vld [vmem:[%s111_s0 + $0x2] sm:$0x1]  }
   0x4   :  { %s71_s24 = smov 48   ;;  %s72_s25 = smov 32   ;;  %v59_v7 = vld [vmem:[%s111_s0 + $0x1] sm:$0x1]   ;;  %vm27_vm4 = vcmask 654848   ;;  %vm33_vm5 = vcmask 523648  }
   0x5   :  { %s73_s0 = smov 16   ;;  %vm39_vm6 = vcmask 392448   ;;  %vm45_vm7 = vcmask 261248  }
   0x6   :  { %13 = vrot.lane.b32.xlu0 %v54_v2, %s69_s18  ;;  %25 = vrot.lane.b32.xlu1 %v56_v3, %s70_s19 }
   0xa   :  { %31 = vrot.lane.b32.xlu0 %v57_v5, %s71_s24  ;;  %37 = vrot.lane.b32.xlu1 %v58_v6, %s72_s25 }
   0xe   :  { %43 = vrot.lane.b32.xlu0 %v59_v7, %s73_s0 }
  0x74   :  { %v8_v8 = vpop.permute.xlu0 %7   ;;  %v20_v9 = vpop.permute.xlu1 %19  }
  0x75   :  { %10 = vst.msk [vmem:[#allocation0] sm:$0x1] %vm9_vm1, %v8_v8  }
  0x78   :  { %v14_v10 = vpop.permute.xlu0 %13   ;;  %v26_v11 = vpop.permute.xlu1 %25  }
  0x79   :  { %16 = vst.msk [vmem:[#allocation0] sm:$0x1] %vm15_vm2, %v14_v10  }
  0x7a   :  { %22 = vst.msk [vmem:[#allocation0] sm:$0x1] %vm21_vm3, %v20_v9  }
  0x7b   :  { %28 = vst.msk [vmem:[#allocation0] sm:$0x1] %vm27_vm4, %v26_v11  }
  0x7c   :  { %v32_v12 = vpop.permute.xlu0 %31   ;;  %v38_v13 = vpop.permute.xlu1 %37  }
  0x7d   :  { %34 = vst.msk [vmem:[#allocation0] sm:$0x1] %vm33_vm5, %v32_v12  }
  0x7e   :  { %40 = vst.msk [vmem:[#allocation0] sm:$0x1] %vm39_vm6, %v38_v13  }
  0x80   :  { %v44_v14 = vpop.permute.xlu0 %43  }
  0x81   :  { %46 = vst.msk [vmem:[#allocation0] sm:$0x1] %vm45_vm7, %v44_v14  }
  0x88   :  { %v50_v15 = vld [vmem:[#allocation0] sm:$0x1] }
  0x89   :  { %52 = vst [vmem:[%s112_s1] sm:$0x1] %v50_v15 }

// kernel: tile.23
= control target key start
LH: loop header
LB: loop body
LE: loop exit
PB: predicated region body
PF: predicated region fallthrough
CT: control target
= control target key end

     0   :  { %s67_s10 = smov 112   ;;  %s68_s11 = smov 80   ;;  %vm3_vm0 = vcmask 130048   ;;  %vm9_vm1 = vcmask 1048448   ;;  %vm15_vm2 = vcmask 917248   ;;  %vm21_vm3 = vcmask 786048   ;;  %s111_s0 = inlined_call_operand.vmem [shape: f32[8,16], index: 0, kind: input, shape index: {}]   ;;  %s112_s1 = inlined_call_operand.vmem [shape: f32[1,128], index: 1, kind: output, shape index: {}]  }
   0x1   :  { %v53_v0 = vld [vmem:[%s111_s0 + $0x7] sm:$0x1]   ;;  %v55_v1 = vld [vmem:[%s111_s0 + $0x5] sm:$0x1]   ;;  %v54_v2 = vld [vmem:[%s111_s0 + $0x6] sm:$0x1]  }
   0x2   :  { %7 = vrot.lane.b32.xlu0 %v53_v0, %s67_s10  ;;  %19 = vrot.lane.b32.xlu1 %v55_v1, %s68_s11  ;;  %v56_v3 = vld [vmem:[%s111_s0 + $0x4] sm:$0x1]   ;;  %v2_v4 = vld [vmem:[%s111_s0] sm:$0x1]   ;;  %s69_s18 = smov 96   ;;  %s70_s19 = smov 64  }
   0x3   :  { %4 = vst.msk [vmem:[#allocation0] sm:$0x1] %vm3_vm0, %v2_v4   ;;  %v57_v5 = vld [vmem:[%s111_s0 + $0x3] sm:$0x1]   ;;  %v58_v6 = vld [vmem:[%s111_s0 + $0x2] sm:$0x1]  }
   0x4   :  { %s71_s24 = smov 48   ;;  %s72_s25 = smov 32   ;;  %v59_v7 = vld [vmem:[%s111_s0 + $0x1] sm:$0x1]   ;;  %vm27_vm4 = vcmask 654848   ;;  %vm33_vm5 = vcmask 523648  }
   0x5   :  { %s73_s0 = smov 16   ;;  %vm39_vm6 = vcmask 392448   ;;  %vm45_vm7 = vcmask 261248  }
   0x6   :  { %13 = vrot.lane.b32.xlu0 %v54_v2, %s69_s18  ;;  %25 = vrot.lane.b32.xlu1 %v56_v3, %s70_s19 }
   0xa   :  { %31 = vrot.lane.b32.xlu0 %v57_v5, %s71_s24  ;;  %37 = vrot.lane.b32.xlu1 %v58_v6, %s72_s25 }
   0xe   :  { %43 = vrot.lane.b32.xlu0 %v59_v7, %s73_s0 }
  0x74   :  { %v8_v8 = vpop.permute.xlu0 %7   ;;  %v20_v9 = vpop.permute.xlu1 %19  }
  0x75   :  { %10 = vst.msk [vmem:[#allocation0] sm:$0x1] %vm9_vm1, %v8_v8  }
  0x78   :  { %v14_v10 = vpop.permute.xlu0 %13   ;;  %v26_v11 = vpop.permute.xlu1 %25  }
  0x79   :  { %16 = vst.msk [vmem:[#allocation0] sm:$0x1] %vm15_vm2, %v14_v10  }
  0x7a   :  { %22 = vst.msk [vmem:[#allocation0] sm:$0x1] %vm21_vm3, %v20_v9  }
  0x7b   :  { %28 = vst.msk [vmem:[#allocation0] sm:$0x1] %vm27_vm4, %v26_v11  }
  0x7c   :  { %v32_v12 = vpop.permute.xlu0 %31   ;;  %v38_v13 = vpop.permute.xlu1 %37  }
  0x7d   :  { %34 = vst.msk [vmem:[#allocation0] sm:$0x1] %vm33_vm5, %v32_v12  }
  0x7e   :  { %40 = vst.msk [vmem:[#allocation0] sm:$0x1] %vm39_vm6, %v38_v13  }
  0x80   :  { %v44_v14 = vpop.permute.xlu0 %43  }
  0x81   :  { %46 = vst.msk [vmem:[#allocation0] sm:$0x1] %vm45_vm7, %v44_v14  }
  0x88   :  { %v50_v15 = vld [vmem:[#allocation0] sm:$0x1] }
  0x89   :  { %52 = vst [vmem:[%s112_s1] sm:$0x1] %v50_v15 }

// kernel: _bayes_fitting_loss_impl.1
= control target key start
LH: loop header
LB: loop body
LE: loop exit
PB: predicated region body
PF: predicated region fallthrough
CT: control target
= control target key end

     0   :  { %s142_s11 = smov 127   ;;  %s197_s1 = inlined_call_operand.vmem [shape: f32[64,128], index: 1, kind: input, shape index: {}]   ;;  %s198_s0 = inlined_call_operand.vmem [shape: f32[4,8,128], index: 0, kind: input, shape index: {}]   ;;  %s199_s2 = inlined_call_operand.vmem [shape: f32[8,128], index: 2, kind: output, shape index: {}]  }
   0x1   :  { %v45_v0 = vld [vmem:[%s197_s1] sm:$0xff]  ;;  %v47_v1 = vld [vmem:[%s197_s1 + $0x10] sm:$0xff]  ;;  %v46_v2 = vld [vmem:[%s197_s1 + $0x8] sm:$0xff] }
   0x2   :  { %53 = vrot.lane.b32.xlu0 %v45_v0, %s142_s11  ;;  %57 = vrot.lane.b32.xlu1 %v47_v1, %s142_s11  ;;  %v48_v3 = vld [vmem:[%s197_s1 + $0x18] sm:$0xff]  ;;  %v49_v4 = vld [vmem:[%s197_s1 + $0x20] sm:$0xff] }
   0x3   :  { %v50_v5 = vld [vmem:[%s197_s1 + $0x28] sm:$0xff]  ;;  %v51_v6 = vld [vmem:[%s197_s1 + $0x30] sm:$0xff]  ;;  %v52_v7 = vld [vmem:[%s197_s1 + $0x38] sm:$0xff] }
   0x4   :  { %v38_v8 = vld [vmem:[%s198_s0] sm:$0xff]  ;;  %v137_v9 = vld [vmem:[%s198_s0 + $0x8] sm:$0xff]  ;;  %v138_v11 = vld [vmem:[%s198_s0 + $0x10] sm:$0xff] }
   0x5   :  { %v69_v10 = vsub.f32 %v45_v0, %v38_v8  ;;  %v71_v12 = vsub.f32 %v47_v1, %v38_v8  ;;  %v139_v14 = vld [vmem:[%s198_s0 + $0x18] sm:$0xff]  ;;  %v70_v15 = vsub.f32 %v46_v2, %v38_v8  ;;  %v72_v18 = vsub.f32 %v48_v3, %v38_v8 }
   0x6   :  { %55 = vrot.lane.b32.xlu0 %v46_v2, %s142_s11  ;;  %59 = vrot.lane.b32.xlu1 %v48_v3, %s142_s11  ;;  %v73_v26 = vsub.f32 %v49_v4, %v38_v8  ;;  %v74_v30 = vsub.f32 %v50_v5, %v38_v8  ;;  %v75_v34 = vsub.f32 %v51_v6, %v38_v8 }
   0x7   :  { %v85_v20 = vmul.f32 %v138_v11, %v69_v10  ;;  %v87_v22 = vmul.f32 %v138_v11, %v71_v12  ;;  %v86_v25 = vmul.f32 %v138_v11, %v70_v15  ;;  %v88_v29 = vmul.f32 %v138_v11, %v72_v18 }
   0x8   :  { %v89_v38 = vmul.f32 %v138_v11, %v73_v26  ;;  %v90_v42 = vmul.f32 %v138_v11, %v74_v30  ;;  %v76_v43 = vsub.f32 %v52_v7, %v38_v8  ;;  %v91_v49 = vmul.f32 %v138_v11, %v75_v34 }
   0xa   :  { %61 = vrot.lane.b32.xlu0 %v49_v4, %s142_s11  ;;  %63 = vrot.lane.b32.xlu1 %v50_v5, %s142_s11  ;;  %v92_v58 = vmul.f32 %v138_v11, %v76_v43 }
   0xe   :  { %65 = vrot.lane.b32.xlu0 %v51_v6, %s142_s11  ;;  %67 = vrot.lane.b32.xlu1 %v52_v7, %s142_s11 }
  0x74   :  { %v54_v13 = vpop.permute.xlu0 %53  ;;  %v58_v17 = vpop.permute.xlu1 %57 }
  0x75   :  { %v77_v16 = vsub.f32 %v54_v13, %v137_v9  ;;  %v79_v19 = vsub.f32 %v58_v17, %v137_v9 }
  0x77   :  { %v93_v21 = vmul.f32 %v139_v14, %v77_v16  ;;  %v95_v23 = vmul.f32 %v139_v14, %v79_v19 }
  0x78   :  { %v56_v24 = vpop.permute.xlu0 %55  ;;  %v60_v28 = vpop.permute.xlu1 %59 }
  0x79   :  { %v78_v27 = vsub.f32 %v56_v24, %v137_v9  ;;  %v80_v31 = vsub.f32 %v60_v28, %v137_v9  ;;  %v101_v32 = vadd.f32 %v93_v21, %v85_v20  ;;  %v103_v35 = vadd.f32 %v95_v23, %v87_v22 }
  0x7b   :  { %v94_v33 = vmul.f32 %v139_v14, %v78_v27  ;;  %v96_v36 = vmul.f32 %v139_v14, %v80_v31  ;;  %v109_v46 = vmul.f32 %v101_v32, %v69_v10  ;;  %v111_v50 = vmul.f32 %v103_v35, %v71_v12 }
  0x7c   :  { %v62_v37 = vpop.permute.xlu0 %61  ;;  %v64_v41 = vpop.permute.xlu1 %63 }
  0x7d   :  { %v102_v39 = vadd.f32 %v94_v33, %v86_v25  ;;  %v81_v40 = vsub.f32 %v62_v37, %v137_v9  ;;  %v104_v44 = vadd.f32 %v96_v36, %v88_v29  ;;  %v82_v45 = vsub.f32 %v64_v41, %v137_v9 }
  0x7f   :  { %v110_v47 = vmul.f32 %v102_v39, %v70_v15  ;;  %v97_v48 = vmul.f32 %v139_v14, %v81_v40  ;;  %v98_v51 = vmul.f32 %v139_v14, %v82_v45  ;;  %v112_v54 = vmul.f32 %v104_v44, %v72_v18 }
  0x80   :  { %v66_v52 = vpop.permute.xlu0 %65  ;;  %v68_v57 = vpop.permute.xlu1 %67 }
  0x81   :  { %v118_v53 = vadd.f32 %v110_v47, %v109_v46  ;;  %v105_v55 = vadd.f32 %v97_v48, %v89_v38  ;;  %v83_v56 = vsub.f32 %v66_v52, %v137_v9  ;;  %v106_v59 = vadd.f32 %v98_v51, %v90_v42 }
  0x82   :  { %v84_v60 = vsub.f32 %v68_v57, %v137_v9 }
  0x83   :  { %v119_v61 = vadd.f32 %v118_v53, %v111_v50  ;;  %v113_v62 = vmul.f32 %v105_v55, %v73_v26  ;;  %v99_v63 = vmul.f32 %v139_v14, %v83_v56  ;;  %v114_v2 = vmul.f32 %v106_v59, %v74_v30 }
  0x84   :  { %v100_v0 = vmul.f32 %v139_v14, %v84_v60 }
  0x85   :  { %v120_v1 = vadd.f32 %v119_v61, %v112_v54  ;;  %v107_v3 = vadd.f32 %v99_v63, %v91_v49 }
  0x86   :  { %v108_v4 = vadd.f32 %v100_v0, %v92_v58 }
  0x87   :  { %v121_v5 = vadd.f32 %v120_v1, %v113_v62  ;;  %v115_v6 = vmul.f32 %v107_v3, %v75_v34 }
  0x88   :  { %v116_v8 = vmul.f32 %v108_v4, %v76_v43 }
  0x89   :  { %v122_v7 = vadd.f32 %v121_v5, %v114_v2 }
  0x8b   :  { %v123_v10 = vadd.f32 %v122_v7, %v115_v6 }
  0x8d   :  { %v124_v12 = vadd.f32 %v123_v10, %v116_v8 }
  0x8f   :  { %126 = vst [vmem:[%s199_s2] sm:$0xff] %v124_v12 }

</bundles_post_ra>
